<compile_context>
chip_gen: v6e
topology: v6e:2x2x1
jax: 0.10.0
libtpu: 0.0.40
codegen_flags: <defaults>
</compile_context>

<pallas_src>
import numpy as np
import jax
import jax.numpy as jnp
from jax.experimental import pallas as pl
from jax.experimental.pallas import tpu as pltpu

W_OUT = 5  # stand-in for params.W_OUT (does not affect the coefficients)


def _round_up(a, b):
    return ((a + b - 1) // b) * b


# ---------------------------------------------------------------------------
# Host-side precompute: integrated Morlet wavelet and per-scale filters
# (mirrors pywt.integrate_wavelet('morl') + pywt._cwt resampling).
# ---------------------------------------------------------------------------
def _morlet_int_psi(precision=10):
    lb, ub = -8.0, 8.0
    npts = 2 ** precision
    xw = np.linspace(lb, ub, npts)
    psi = np.exp(-(xw ** 2) / 2.0) * np.cos(5.0 * xw)
    step = xw[1] - xw[0]
    int_psi = np.cumsum(psi) * step
    return int_psi, xw


def _scale_filter(scale, int_psi, xw):
    step = xw[1] - xw[0]
    j = np.arange(scale * (xw[-1] - xw[0]) + 1) / (scale * step)
    j = j.astype(int)
    j = j[j < int_psi.size]
    return int_psi[j][::-1]


def build_cwt_blocks(scales, n, tk, tn):
    """Blocked CWT matrix + per-column-tile non-zero K-block schedule.

    Returns:
      w_blocks: (nK, nJ, tk, tn) f32, W[k, s*n_pad + m] re-laid out so every
                (tk, tn) tile is contiguous in HBM.
      kmap:     (nJ*gk,) i32 flat schedule; entry j*gk+t = K-block fetched at
                reduction step t of column tile j (padded slots repeat the last
                real block so the pipeline can elide the DMA).
      knnz:     (nJ,) i32 number of real (non-zero) K-blocks per column tile.
      n_pad:    per-scale padded column count (multiple of tn).
      k_pad:    padded contraction length (multiple of tk).
    """
    int_psi, xw = _morlet_int_psi()
    S = len(scales)
    n_pad = _round_up(n, tn)
    k_pad = _round_up(n, tk)
    nK = k_pad // tk
    nJ = S * (n_pad // tn)

    km = np.arange(n)
    delta = km[None, :] - km[:, None]            # (k, m): m - k
    w = np.zeros((k_pad, S, n_pad), np.float64)
    for si, scale in enumerate(scales):
        ips = _scale_filter(scale, int_psi, xw)                  # length L
        ips_pad = np.concatenate(([0.0], ips, [0.0]))            # exact conv boundaries
        h = -np.sqrt(scale) * np.diff(ips_pad)                   # length L+1
        start = int(np.floor((ips.size - 2) / 2.0))              # pywt center-crop offset
        idx = start + delta + 1                                  # +1 for the zero pre-pad
        mask = (idx >= 0) & (idx < h.size)
        w[:n, si, :n] = np.where(mask, h[np.clip(idx, 0, h.size - 1)], 0.0)

    wf = w.reshape(k_pad, S * n_pad)
    wb = wf.reshape(nK, tk, nJ, tn).transpose(0, 2, 1, 3).astype(np.float32)

    nz = np.abs(wb).max(axis=(2, 3)) > 0.0        # (nK, nJ)
    gk = int(max(1, nz.sum(axis=0).max()))
    kmap = np.zeros((nJ, gk), np.int32)
    knnz = np.zeros((nJ,), np.int32)
    for j in range(nJ):
        ks = np.nonzero(nz[:, j])[0].astype(np.int32)
        knnz[j] = ks.size
        if ks.size == 0:
            ks = np.array([0], np.int32)          # never accumulated (knnz == 0)
        kmap[j, :ks.size] = ks
        kmap[j, ks.size:] = ks[-1]                # repeat last -> DMA elided, masked off
    return wb, kmap.reshape(-1), knnz, n_pad, k_pad


# ---------------------------------------------------------------------------
# Pallas kernel: output-resident accumulation over the scheduled K-blocks
# ---------------------------------------------------------------------------
def _make_cwt_kernel(tk, gk):
    def kernel(kmap_ref, knnz_ref, x_ref, w_ref, o_ref):
        j = pl.program_id(0)
        k = pl.program_id(1)

        @pl.when(k == 0)
        def _init():
            o_ref[...] = jnp.zeros_like(o_ref)

        @pl.when(k < knnz_ref[j])                 # skip padded (all-zero) K-blocks
        def _accum():
            kblk = kmap_ref[j * gk + k]
            off = pl.multiple_of(kblk * tk, tk)
            xk = x_ref[:, pl.ds(off, tk)]         # x pinned in VMEM, sliced here
            o_ref[...] += jnp.dot(xk, w_ref[0, 0],
                                  preferred_element_type=jnp.float32)

        @pl.when(k == pl.num_programs(1) - 1)
        def _finalize():
            o_ref[...] = jnp.abs(o_ref[...])

    return kernel


def _pick_tiles(n):
    # TK = 128: finest zero-block skip granularity; the kernel is HBM-bound so
    # under-filling the 256-wide MXU contraction is free.  TN lane-dense and at
    # most one scale wide so narrow-band sparsity is preserved.
    tk = 128
    tn = 256 if n >= 256 else 128
    return tk, tn


def wt_embedding(x, w_blocks, kmap, knnz, emb_size, n, n_pad):
    """x: (B, N) f32 -> (B, emb_size, N) f32 == |cwt(x)| transposed to batch-major."""
    B, N = x.shape
    nK, nJ, TK, TN = w_blocks.shape
    k_pad = nK * TK
    m_pad = nJ * TN
    gk = kmap.shape[0] // nJ
    b_pad = max(8, _round_up(B, 8))               # fill f32 sublanes / MXU rows

    x_p = jnp.zeros((b_pad, k_pad), jnp.float32).at[:B, :N].set(x.astype(jnp.float32))

    kernel = _make_cwt_kernel(TK, gk)

    # x resident + double-buffered W tile + double-buffered output tile.
    vmem_est = (2 * b_pad * k_pad + 2 * TK * TN + 2 * b_pad * TN) * 4
    vmem_limit = int(min(max(4 * vmem_est, 32 << 20), 48 << 20))

    out_flat = pl.pallas_call(
        kernel,
        out_shape=jax.ShapeDtypeStruct((b_pad, m_pad), jnp.float32),
        grid_spec=pltpu.PrefetchScalarGridSpec(
            num_scalar_prefetch=2,
            grid=(nJ, gk),
            in_specs=[
                # x: constant block index -> fetched to VMEM once, never re-DMA'd.
                pl.BlockSpec((b_pad, k_pad), lambda j, k, km, nn: (0, 0)),
                # W: one contiguous (TK, TN) block, K-block chosen by the schedule.
                pl.BlockSpec((1, 1, TK, TN),
                             lambda j, k, km, nn: (km[j * gk + k], j, 0, 0)),
            ],
            out_specs=pl.BlockSpec((b_pad, TN), lambda j, k, km, nn: (0, j)),
        ),
        compiler_params=pltpu.CompilerParams(
            dimension_semantics=("parallel", "arbitrary"),
            vmem_limit_bytes=vmem_limit,
        ),
    )(kmap, knnz, x_p, w_blocks)

    # Columns are laid out scale-major (s * n_pad + m): transpose(0,1) is a reshape.
    return out_flat[:B].reshape(B, emb_size, n_pad)[:, :, :n]


# ---------------------------------------------------------------------------
# NumPy reference (direct pywt-style algorithm) for verification
# ---------------------------------------------------------------------------
def reference_wt_embedding(x_np, scales):
    int_psi, xw = _morlet_int_psi()
    B, N = x_np.shape
    outs = []
    for scale in scales:
        ips = _scale_filter(scale, int_psi, xw)
        rows = []
        for b in range(B):
            conv = np.convolve(x_np[b].astype(np.float64), ips)
            coef = -np.sqrt(scale) * np.diff(conv)
            d = (coef.shape[-1] - N) / 2.0
            if d > 0:
                coef = coef[int(np.floor(d)): -int(np.ceil(d))]
            rows.append(coef)
        outs.append(np.stack(rows))
    out = np.abs(np.stack(outs))                  # (S, B, N)
    return np.transpose(out, (1, 0, 2)).astype(np.float32)


if __name__ == "__main__":
    emb_size = 8          # number of wavelet scales
    B, N = 2, 512         # small batch / sequence length (band sparsity visible at N=512)

    scales = np.geomspace(1.0, 1000.0, num=emb_size)
    time = np.linspace(0.0, 4.0 * W_OUT, num=1024 * W_OUT)
    sample_period = np.diff(time).mean()          # unused by coefficients (pywt semantics)

    TK, TN = _pick_tiles(N)
    wb, kmap, knnz, n_pad, k_pad = build_cwt_blocks(scales, N, TK, TN)
    wb_d = jnp.asarray(wb)
    kmap_d = jnp.asarray(kmap)
    knnz_d = jnp.asarray(knnz)

    key = jax.random.PRNGKey(0)
    x = jax.random.normal(key, (B, N), dtype=jnp.float32)

    out = wt_embedding(x, wb_d, kmap_d, knnz_d, emb_size, N, n_pad)
    out = jax.block_until_ready(out)

    assert out.shape == (B, emb_size, N), out.shape
    assert out.dtype == jnp.float32

    ref = reference_wt_embedding(np.asarray(x), scales)
    if not np.allclose(np.asarray(out), ref, rtol=1e-3, atol=1e-3):
        err = float(np.max(np.abs(np.asarray(out) - ref)))
        raise AssertionError(f"Pallas CWT embedding does not match reference (max err {err})")

    print("KERNEL_OK")
</pallas_src>

<mosaic_0001>
module attributes {stable_mosaic.version = 11 : i64} {
  func.func @kernel(%arg0: i32, %arg1: i32, %arg2: memref<64xi32, #tpu.memory_space<smem>>, %arg3: memref<16xi32, #tpu.memory_space<smem>>, %arg4: memref<8x512xf32, #tpu.memory_space<vmem>>, %arg5: memref<1x1x128x256xf32, #tpu.memory_space<vmem>>, %arg6: memref<8x256xf32, #tpu.memory_space<vmem>>) attributes {dimension_semantics = [#tpu.dimension_semantics<parallel>, #tpu.dimension_semantics<arbitrary>], iteration_bounds = array<i64: 16, 4>, scalar_prefetch = 2 : i64, scratch_operands = 0 : i64, tpu.core_type = #tpu.core_type<tc>, window_params = [{pipeline_mode = #tpu.pipeline_mode<synchronous>, transform_indices = @transform_0, window_bounds = array<i64: 8, 512>}, {transform_indices = @transform_1, window_bounds = array<i64: 1, 1, 128, 256>}, {transform_indices = @transform_2, window_bounds = array<i64: 8, 256>}]} {
    %c0_i32 = arith.constant 0 : i32
    %0 = arith.cmpi eq, %arg1, %c0_i32 : i32
    %1 = arith.extui %0 : i1 to i32
    %c0_i32_0 = arith.constant 0 : i32
    %2 = arith.cmpi ne, %1, %c0_i32_0 : i32
    scf.if %2 {
      %cst = arith.constant 0.000000e+00 : f32
      %11 = vector.broadcast %cst : f32 to vector<8x256xf32>
      %c0 = arith.constant 0 : index
      %c0_3 = arith.constant 0 : index
      %12 = vector.load %arg6[%c0, %c0_3] : memref<8x256xf32, #tpu.memory_space<vmem>>, vector<8x256xf32>
      tpu.vector_store %arg6[%c0, %c0_3], %11 {strides = array<i32>} : memref<8x256xf32, #tpu.memory_space<vmem>>, vector<8x256xf32>,
    } else {
    }
    %3 = arith.index_cast %arg0 : i32 to index
    %4 = memref.load %arg3[%3] : memref<16xi32, #tpu.memory_space<smem>>
    %5 = arith.cmpi slt, %arg1, %4 : i32
    %6 = arith.extui %5 : i1 to i32
    %c0_i32_1 = arith.constant 0 : i32
    %7 = arith.cmpi ne, %6, %c0_i32_1 : i32
    scf.if %7 {
      %c4_i32 = arith.constant 4 : i32
      %11 = arith.muli %arg0, %c4_i32 : i32
      %12 = arith.addi %11, %arg1 : i32
      %13 = arith.index_cast %12 : i32 to index
      %14 = memref.load %arg2[%13] : memref<64xi32, #tpu.memory_space<smem>>
      %c128_i32 = arith.constant 128 : i32
      %15 = arith.muli %14, %c128_i32 : i32
      %16 = tpu.assume_multiple %15, 128 : i32
      %c0 = arith.constant 0 : index
      %17 = arith.index_cast %16 : i32 to index
      %18 = vector.load %arg4[%c0, %17] : memref<8x512xf32, #tpu.memory_space<vmem>>, vector<8x128xf32>
      %c0_3 = arith.constant 0 : index
      %c0_4 = arith.constant 0 : index
      %19 = vector.load %arg6[%c0_3, %c0_4] : memref<8x256xf32, #tpu.memory_space<vmem>>, vector<8x256xf32>
      %c0_5 = arith.constant 0 : index
      %c0_6 = arith.constant 0 : index
      %c0_7 = arith.constant 0 : index
      %c0_8 = arith.constant 0 : index
      %20 = vector.load %arg5[%c0_5, %c0_6, %c0_7, %c0_8] : memref<1x1x128x256xf32, #tpu.memory_space<vmem>>, vector<1x1x128x256xf32>
      %21 = vector.shape_cast %20 : vector<1x1x128x256xf32> to vector<128x256xf32>
      %cst = arith.constant dense<0.000000e+00> : vector<8x256xf32>
      %22 = tpu.matmul %18, %21, %cst {dimension_numbers = #tpu.dot_dimension_numbers<[1], [0], [0], [1], [0, 0, 1, 1], [], []>} : vector<8x128xf32>, vector<128x256xf32>, vector<8x256xf32> -> vector<8x256xf32>
      %23 = arith.addf %19, %22 : vector<8x256xf32>
      %c0_9 = arith.constant 0 : index
      %c0_10 = arith.constant 0 : index
      %24 = vector.load %arg6[%c0_9, %c0_10] : memref<8x256xf32, #tpu.memory_space<vmem>>, vector<8x256xf32>
      tpu.vector_store %arg6[%c0_9, %c0_10], %23 {strides = array<i32>} : memref<8x256xf32, #tpu.memory_space<vmem>>, vector<8x256xf32>,
    } else {
    }
    %c3_i32 = arith.constant 3 : i32
    %8 = arith.cmpi eq, %arg1, %c3_i32 : i32
    %9 = arith.extui %8 : i1 to i32
    %c0_i32_2 = arith.constant 0 : i32
    %10 = arith.cmpi ne, %9, %c0_i32_2 : i32
    scf.if %10 {
      %c0 = arith.constant 0 : index
      %c0_3 = arith.constant 0 : index
      %11 = vector.load %arg6[%c0, %c0_3] : memref<8x256xf32, #tpu.memory_space<vmem>>, vector<8x256xf32>
      %12 = math.absf %11 : vector<8x256xf32>
      %c0_4 = arith.constant 0 : index
      %c0_5 = arith.constant 0 : index
      %13 = vector.load %arg6[%c0_4, %c0_5] : memref<8x256xf32, #tpu.memory_space<vmem>>, vector<8x256xf32>
      tpu.vector_store %arg6[%c0_4, %c0_5], %12 {strides = array<i32>} : memref<8x256xf32, #tpu.memory_space<vmem>>, vector<8x256xf32>,
    } else {
    }
    return
  }
  func.func @transform_0(%arg0: i32, %arg1: i32, %arg2: memref<64xi32, #tpu.memory_space<smem>>, %arg3: memref<16xi32, #tpu.memory_space<smem>>) -> (i32, i32) {
    %c0_i32 = arith.constant 0 : i32
    %c0_i32_0 = arith.constant 0 : i32
    %c0_i32_1 = arith.constant 0 : i32
    return %c0_i32, %c0_i32_0 : i32, i32
  }
  func.func @transform_1(%arg0: i32, %arg1: i32, %arg2: memref<64xi32, #tpu.memory_space<smem>>, %arg3: memref<16xi32, #tpu.memory_space<smem>>) -> (i32, i32, i32, i32) {
    %c4_i32 = arith.constant 4 : i32
    %0 = arith.muli %arg0, %c4_i32 : i32
    %1 = arith.addi %0, %arg1 : i32
    %2 = arith.index_cast %1 : i32 to index
    %3 = memref.load %arg2[%2] : memref<64xi32, #tpu.memory_space<smem>>
    %c0_i32 = arith.constant 0 : i32
    %c0_i32_0 = arith.constant 0 : i32
    %c0_i32_1 = arith.constant 0 : i32
    return %3, %arg0, %c0_i32, %c0_i32_0 : i32, i32, i32, i32
  }
  func.func @transform_2(%arg0: i32, %arg1: i32, %arg2: memref<64xi32, #tpu.memory_space<smem>>, %arg3: memref<16xi32, #tpu.memory_space<smem>>) -> (i32, i32) {
    %c0_i32 = arith.constant 0 : i32
    %c0_i32_0 = arith.constant 0 : i32
    return %c0_i32, %arg0 : i32, i32
  }
}

</mosaic_0001>

<bundles_post_ra>
// kernel: tpu_custom_call.1
= control target key start
LH: loop header
LB: loop body
LE: loop exit
PB: predicated region body
PF: predicated region fallthrough
CT: control target
= control target key end

     0   :  { %s813_s15 = smov [#allocation3]   ;;  %s814_s18 = smov [#allocation4]   ;;  %s1141_s0 = inlined_call_operand.hbm [shape: s32[64], index: 0, kind: input, shape index: {}]   ;;  %s1142_s2 = inlined_call_operand.hbm [shape: f32[8,512], index: 2, kind: input, shape index: {}]   ;;  %s1143_s3 = inlined_call_operand.hbm [shape: f32[4,16,128,256], index: 3, kind: input, shape index: {}]   ;;  %s1144_s4 = inlined_call_operand.hbm [shape: f32[8,4096], index: 4, kind: output, shape index: {}]   ;;  %s1145_s1 = inlined_call_operand.hbm [shape: s32[16], index: 1, kind: input, shape index: {}]  }
   0x1   :  { %1162 = sst [smem:[#allocation27_spill]] %s1142_s2 }
   0x2   :  { %1163 = sst [smem:[#allocation28_spill]] %s1144_s4 }
   0x3   :  { %10 = dma.hbm_to_smem %s1141_s0, 16, %s813_s15, [#allocation2] }
   0x4   :  { %12 = dma.hbm_to_smem %s1145_s1, 16, %s814_s18, [#allocation2] }
   0x5   :  { %755 = dma.done.wait [#allocation2], 32 }
   0x6   :  { %756 = vsyncadd [#allocation2], 4294967264 }
   0x7   :  { %14 = sfence }
   0x8   :  { %15 = vsyncpa [#allocation6], 0 }
   0x9   :  { %16 = vsyncpa [#allocation9], 0 }
   0xa   :  { %18 = vsyncpa [#allocation9 + $0x1], 0 }
   0xb   :  { %19 = vsyncpa [#allocation7], 0 }
   0xc   :  { %21 = vsyncpa [#allocation7 + $0x1], 0  ;;  %s853_s21 = smov 0   ;;  %s855_s22 = smov 0  }
   0xd   :  { %s857_s23 = smov 0   ;;  %s859_s0 = smov 0  }
   0xe   :  { %s861_s24 = smov 0   ;;  %s863_s25 = smov 0  }
   0xf   :  { %s865_s1 = smov 0   ;;  %s867_s26 = smov 0  }
  0x10   :  { %s869_s27 = smov 0   ;;  %s871_s28 = smov 0  }
  0x11   :  { %s873_s29 = smov 0  }
  0x12 LB: > { %1164 = sst [smem:[#allocation17_spill]] %s771_s21  ;;  %s464_s30 = sadd.s32 4294967295, %s811_s29   ;;  %s811_s29 = sphi %s873_s29, %s27_s29   ;;  %s807_s28 = sphi %s871_s28, %s1207_s28   ;;  %s803_s27 = sphi %s869_s27, %s1199_s27   ;;  %s799_s26 = sphi %s867_s26, %s1206_s26   ;;  %s795_s1 = sphi %s865_s1, %s1198_s1   ;;  %s791_s25 = sphi %s863_s25, %s1205_s25   ;;  %s787_s24 = sphi %s861_s24, %s1204_s24   ;;  %s783_s0 = sphi %s859_s0, %s1203_s0   ;;  %s779_s23 = sphi %s857_s23, %s1197_s23   ;;  %s775_s22 = sphi %s855_s22, %s1202_s22   ;;  %s771_s21 = sphi %s853_s21, %s1201_s21  }
  0x13   : > { %1165 = sst [smem:[#allocation18_spill]] %s779_s23  ;;  %p82_p0 = scmp.ne.s32.totalorder %s791_s25, %s787_s24 }
  0x14   : > { %1166 = sst [smem:[#allocation19_spill]] %s799_s26  ;;  %p83_p1 = scmp.eq.s32.totalorder %s811_s29, 0 }
  0x15   : > { %1167 = sst [smem:[#allocation20_spill]] %s803_s27  ;;  %p88_p2 = scmp.ne.s32.totalorder %s787_s24, %s783_s0 }
  0x16   : > { %1168 = sst [smem:[#allocation21_spill]] %s811_s29  ;;  %s465_s5 = sadd.s32 4294967294, %s811_s29  }
  0x17   : > { %p912_p3 = scmp.eq.s32.totalorder %s464_s30, 0  ;;  %p916_p4 = por %p83_p1, %p82_p0 }
  0x18   : > { %p111_p5 = scmp.ne.s32.totalorder %s779_s23, %s775_s22  ;;  %p112_p7 = scmp.eq.s32.totalorder %s464_s30, 63 }
  0x19   : > { %s1169_s6 = scalar_select %p912_p3, 1, 0 }
  0x1a   : > { %p924_p6 = por %p912_p3, %p88_p2  ;;  %p117_p8 = scmp.ne.s32.totalorder %s775_s22, %s771_s21 }
  0x1b   : > { %p118_p9 = scmp.eq.s32.totalorder %s465_s5, 63  ;;  %p930_p10 = por %p112_p7, %p111_p5 }
  0x1c   : > { %s1171_s8 = scalar_select %p924_p6, 1, 0 }
  0x1d   : > { %s1172_s9 = scalar_select %p930_p10, 1, 0 }
  0x1e   : > { %p468_p11 = scmp.ge.s32.totalorder %s811_s29, 1  ;;  %p935_p12 = por %p118_p9, %p117_p8 }
  0x1f   : > { %1173 = sst [smem:[#allocation22_spill]] %s1172_s9  ;;  %p125_p13 = scmp.lt.s32.totalorder %s811_s29, 65 }
  0x20   : > { %s1174_s10 = scalar_select %p935_p12, 1, 0 }
  0x21   : > { %p940_p0 = pnand %p468_p11, %p125_p13  ;;  %s815_s12 = smov [#allocation5]  }
  0x22   : > { %1175 = sst [smem:[#allocation23_spill]] %s1174_s10  ;;  %s138_s13 = sshll.u32 %s815_s12, 4  ;;  %s139_s13 = int_to_ptr.vmem [resolvable:$true] %s138_s13 }
  0x23   : > { %s1176_s11 = scalar_select %p940_p0, 1, 0 }
  0x24   : > { %p502_p1 = pneg %p940_p0  ;;  %p517_p2 = scmp.lt.s32.totalorder %s811_s29, 64 }
  0x25   : > { %s642_s15 = scalar_lea.vmem %s139_s13, 512  ;;  %p650_p12 = scmp.lt.s32.totalorder %s139_s13, %s139_s13 }
  0x26   : > { %p503_p5 = pnand %p502_p1, %p912_p3  ;;  %p953_p7 = pnand %p517_p2, %p916_p4 }
  0x27   : > { %p643_p9 = scmp.ne.s32.totalorder %s139_s13, %s642_s15  ;;  %p651_p10 = scmp.lt.s32.totalorder %s642_s15, %s642_s15 }
  0x28   : > { %p633_p8 = pneg %p503_p5 }
  0x29   : > { %p652_p6 = por %p651_p10, %p650_p12 }
  0x2a   : > { %p645_p11 = pnand %p643_p9, %p633_p8 }
  0x2c   : > { %p646_p13 = pneg %p645_p11 }
  0x2e   : > { %p653_p0 = pnand %p652_p6, %p646_p13 }
  0x30   : > { %656 = shalt.err (!%p653_p0)
}
  0x31   : > { %s1178_s2 = sld [smem:[#allocation27_spill]]  ;;  %s36_s18 = sadd.s32 1, %s803_s27 }
  0x32   : > { %p37_p1 = scmp.ge.s32.totalorder %s36_s18, 4  ;;  %s39_s19 = sadd.s32 1, %s807_s28 }
  0x33   : > { %s101_s20 = sadd.s32 1, %s779_s23  ;;  %s466_s0 = sshll.u32 %s807_s28, 2 }
  0x34   : > { %s1209_s19 = smov (!%p37_p1, %s39_s19), %s807_s28  ;;  %s1211_s18 = smov (%p37_p1, %s36_s18), 0 }
  0x35   : > { %1179 = sst [smem:[#allocation24_spill]] %s1211_s18  ;;  %p41_p6 = scmp.ge.s32.totalorder %s1209_s19, 16 }
  0x36   : > { %s65_s30 = sadd.s32 %s803_s27, %s466_s0  ;;  %s149_s12 = sand.u32 1, %s791_s25  }
  0x37   : > { %505 = dma.hbm_to_vmem [thread:$0]  (!%p503_p5), %s1178_s2, 512, %s139_s13, [#allocation6]  }
  0x38   : > { %s66_s5 = sld [smem:[#allocation3 + %s65_s30]]  ;;  %s1213_s19 = smov (%p41_p6, %s1209_s19), 0 }
  0x39   : > { %1180 = sst [smem:[#allocation25_spill]] %s1213_s19  ;;  %s467_s15 = sshll.u32 %s1213_s19, 2 }
  0x3a   : > { %s494_s13 = scalar_select %p916_p4, [#allocation3], [#allocation11] }
  0x3b   : > { %s71_s16 = ssub.s32 %s807_s28, %s1213_s19  ;;  %s68_s17 = sadd.s32 %s467_s15, %s1211_s18 }
  0x3c   : > { %p99_p10 = scmp.eq.s32.totalorder %s71_s16, 0  ;;  %s69_s2 = sld [smem:[#allocation3 + %s68_s17]] }
  0x3d   : > { %s471_s10 = sshll.u32 %s149_s12, 8  ;;  %s1215_s30 = smov (!%p916_p4, %s65_s30), 0 }
  0x3e   : > { %s978_s21 = scalar_select %p99_p10, %s779_s23, %s101_s20  }
  0x3f   : > { %s1217_s13 = smov (!%p517_p2, %s494_s13), [#allocation12]  ;;  %s1219_s30 = smov (!%p517_p2, %s1215_s30), 0 }
  0x40   : > { %1181 = sst [smem:[#allocation26_spill]] %s978_s21  ;;  %s75_s4 = sadd.s32 1, %s791_s25 }
  0x41   : > { %s156_s27 = sld [smem:[%s1217_s13 + %s1219_s30]]  ;;  %s153_s19 = scalar_lea.vmem [#allocation8], %s471_s10 }
  0x42   : > { %s70_s0 = ssub.s32 %s66_s5, %s69_s2  ;;  %s165_s15 = sshll.u32 %s153_s19, 4  ;;  %s991_s15 = int_to_ptr.vmem [resolvable:$true] %s165_s15 }
  0x43   : > { %s72_s9 = sor.u32 %s71_s16, %s70_s0  ;;  %s473_s18 = sshll.u32 %s807_s28, 5 }
  0x44   : > { %p73_p12 = scmp.eq.s32.totalorder %s72_s9, 0  ;;  %s998_s2 = scalar_lea.sflag [#allocation9], %s149_s12 }
  0x45   : > { %p659_p0 = pneg %p953_p7  ;;  %s662_s10 = scalar_lea.hbm %s1143_s3, 262144 }
  0x46   : > { %s989_s26 = scalar_select %p73_p12, %s791_s25, %s75_s4  }
  0x47   : > { %s474_s20 = sshll.u32 %s156_s27, 9 }
  0x48   : > { %s162_s7 = sadd.s32 %s474_s20, %s473_s18 }
  0x49   : > { %s475_s17 = sshll.u32 %s162_s7, 7 }
  0x4a   : > { %s996_s29 = scalar_lea.hbm %s1143_s3, %s475_s17 }
  0x4b   : > { %s657_s9 = scalar_lea.hbm %s996_s29, 4096  ;;  %p663_p8 = scmp.lt.s32.totalorder %s996_s29, %s1143_s3 }
  0x4c   : > { %p658_p4 = scmp.ne.s32.totalorder %s996_s29, %s657_s9  ;;  %p664_p9 = scmp.lt.s32.totalorder %s662_s10, %s657_s9 }
  0x4e   : > { %p660_p2 = pnand %p659_p0, %p658_p4  ;;  %p665_p11 = por %p664_p9, %p663_p8 }
  0x50   : > { %p661_p5 = pneg %p660_p2 }
  0x52   : > { %p666_p13 = pnand %p665_p11, %p661_p5 }
  0x54   : > { %669 = shalt.err (!%p666_p13)
}
  0x55   : > { %s670_s21 = scalar_lea.vmem %s991_s15, 4096  ;;  %s816_s23 = smov [#allocation8]  }
  0x56   : > { %p671_p1 = scmp.ne.s32.totalorder %s991_s15, %s670_s21  ;;  %s675_s30 = sshll.u32 %s816_s23, 4  ;;  %s676_s30 = int_to_ptr.vmem [resolvable:$false] %s675_s30 }
  0x57   : > { %s677_s5 = scalar_lea.vmem %s676_s30, 8192  ;;  %p678_p12 = scmp.lt.s32.totalorder %s991_s15, %s676_s30 }
  0x58   : > { %p673_p6 = pnand %p671_p1, %p659_p0  ;;  %p679_p4 = scmp.lt.s32.totalorder %s677_s5, %s670_s21 }
  0x5a   : > { %p674_p10 = pneg %p673_p6  ;;  %p680_p2 = por %p679_p4, %p678_p12 }
  0x5c   : > { %p681_p3 = pnand %p680_p2, %p674_p10 }
  0x5e   : > { %684 = shalt.err (!%p681_p3)
}
  0x5f   : > { %s817_s12 = smov 256   ;;  %s818_s13 = smov 16  }
  0x60   : > { %511 = dma.hbm_to_vmem [thread:$0]  (!%p953_p7), %s996_s29, 4096, %s991_s15, %s998_s2, %s817_s12, %s817_s12, %s818_s13  }
  0x61   : > { %p1182_p0 = scmp.ne.s32.totalorder %s1176_s11, 0 }
  0x62   : > { %p1183_p5 = scmp.ne.s32.totalorder (!%p1182_p0), %s1169_s6, 0 }
  0x63   : > { %177 = sbr.rel (%p1182_p0) target bundleno = 406 (0x196), region = 28 }
  0x68   : > { %758 = dma.done.wait (%p1183_p5), [#allocation6], 512  }
  0x69   : > { %760 = vsyncadd (%p1183_p5), [#allocation6], 4294966784  ;;  %s183_s16 = sand.u32 1, %s787_s24   ;;  %p1184_p3 = scmp.ne.s32.totalorder %s1171_s8, 0 }
  0x6a   : > { %s478_s0 = sshll.u32 %s183_s16, 8  ;;  %s184_s20 = scalar_lea.sflag [#allocation9], %s183_s16 }
  0x6b   : > { %s1026_s7 = scalar_lea.vmem [#allocation8], %s478_s0 }
  0x6c   : > { %762 = dma.done.wait (%p1184_p3), %s184_s20, 4096  }
  0x6d   : > { %764 = vsyncadd (%p1184_p3), %s184_s20, 4294963200  ;;  %s205_s29 = sand.u32 1, %s775_s22   ;;  %p480_p7 = scmp.ne.s32.totalorder %s795_s1, 0 }
  0x6e   : > { %s479_s11 = sshll.u32 %s205_s29, 4 }
  0x6f   : > { %s1035_s14 = scalar_lea.vmem [#allocation10], %s479_s11  ;;  %215 = sbr.rel (%p480_p7) target bundleno = 118 (0x76), region = 40 }
  0x74   : > { %v819_v0 = vmov 0.0  }
  0x75   : > { %216 = vst [vmem:[%s1035_s14] sm:$0xff] %v819_v0  ;;  %217 = vst [vmem:[%s1035_s14 + $0x8] sm:$0xff] %v819_v0 }
  0x76 PF: > { %s1185_s6 = sld [smem:[#allocation19_spill]] }
  0x7c   : > { %s218_s15 = sld [smem:[#allocation4 + %s1185_s6]] }
  0x82   : > { %p481_p8 = scmp.ge.s32.totalorder %s795_s1, %s218_s15 }
  0x83   : > { %s1186_s8 = sld [smem:[#allocation19_spill]] (!%p481_p8) }
  0x84   : > { %222 = sbr.rel (%p481_p8) target bundleno = 368 (0x170), region = 44 }
  0x89   : > { %v265_v1 = vld [vmem:[%s1026_s7 + $0xf8] sm:$0xff]  ;;  %v264_v2 = vld [vmem:[%s1026_s7 + $0xf0] sm:$0xff]  ;;  %v263_v3 = vld [vmem:[%s1026_s7 + $0xe8] sm:$0xff]  ;;  %v820_v5 = vmov 0.0   ;;  %s482_s17 = sshll.u32 %s1186_s8, 2 }
  0x8a   : > { %266 = vmatprep.subr.mxu0 %v265_v1  ;;  %v262_v4 = vld [vmem:[%s1026_s7 + $0xe0] sm:$0xff]  ;;  %330 = vmatprep.mubr.f32.mxu0 %v820_v5  ;;  %v261_v6 = vld [vmem:[%s1026_s7 + $0xd8] sm:$0xff]  ;;  %v260_v7 = vld [vmem:[%s1026_s7 + $0xd0] sm:$0xff]  ;;  %s224_s2 = sadd.s32 %s795_s1, %s482_s17 }
  0x8b   : > { %267 = vmatpush1.msra.mxu0 %v264_v2  ;;  %v259_v8 = vld [vmem:[%s1026_s7 + $0xc8] sm:$0xff]  ;;  %v258_v9 = vld [vmem:[%s1026_s7 + $0xc0] sm:$0xff]  ;;  %v257_v10 = vld [vmem:[%s1026_s7 + $0xb8] sm:$0xff]  ;;  %s225_s9 = sld [smem:[#allocation3 + %s224_s2]] }
  0x8c   : > { %268 = vmatprep.subr.mxu0 %v263_v3  ;;  %v256_v11 = vld [vmem:[%s1026_s7 + $0xb0] sm:$0xff]  ;;  %v255_v12 = vld [vmem:[%s1026_s7 + $0xa8] sm:$0xff]  ;;  %v254_v13 = vld [vmem:[%s1026_s7 + $0xa0] sm:$0xff] }
  0x8d   : > { %269 = vmatpush1.msra.mxu0 %v262_v4  ;;  %v253_v14 = vld [vmem:[%s1026_s7 + $0x98] sm:$0xff]  ;;  %v252_v15 = vld [vmem:[%s1026_s7 + $0x90] sm:$0xff]  ;;  %v251_v16 = vld [vmem:[%s1026_s7 + $0x88] sm:$0xff] }
  0x8e   : > { %270 = vmatprep.subr.mxu0 %v261_v6  ;;  %v250_v17 = vld [vmem:[%s1026_s7 + $0x80] sm:$0xff]  ;;  %v249_v18 = vld [vmem:[%s1026_s7 + $0x78] sm:$0xff]  ;;  %v248_v19 = vld [vmem:[%s1026_s7 + $0x70] sm:$0xff] }
  0x8f   : > { %271 = vmatpush1.msra.mxu0 %v260_v7  ;;  %v247_v20 = vld [vmem:[%s1026_s7 + $0x68] sm:$0xff]  ;;  %v246_v21 = vld [vmem:[%s1026_s7 + $0x60] sm:$0xff]  ;;  %v245_v22 = vld [vmem:[%s1026_s7 + $0x58] sm:$0xff] }
  0x90   : > { %272 = vmatprep.subr.mxu0 %v259_v8  ;;  %v244_v23 = vld [vmem:[%s1026_s7 + $0x50] sm:$0xff]  ;;  %v243_v24 = vld [vmem:[%s1026_s7 + $0x48] sm:$0xff]  ;;  %v242_v25 = vld [vmem:[%s1026_s7 + $0x40] sm:$0xff] }
  0x91   : > { %273 = vmatpush1.msra.mxu0 %v258_v9  ;;  %s483_s4 = sshll.u32 %s225_s9, 7  ;;  %v241_v26 = vld [vmem:[%s1026_s7 + $0x38] sm:$0xff]  ;;  %v240_v27 = vld [vmem:[%s1026_s7 + $0x30] sm:$0xff]  ;;  %v239_v28 = vld [vmem:[%s1026_s7 + $0x28] sm:$0xff] }
  0x92   : > { %274 = vmatprep.subr.mxu0 %v257_v10  ;;  %s227_s27 = sshra.s32 %s483_s4, 7  ;;  %v238_v29 = vld [vmem:[%s1026_s7 + $0x20] sm:$0xff]  ;;  %v237_v30 = vld [vmem:[%s1026_s7 + $0x18] sm:$0xff]  ;;  %v236_v31 = vld [vmem:[%s1026_s7 + $0x10] sm:$0xff] }
  0x93   : > { %275 = vmatpush1.msra.mxu0 %v256_v11  ;;  %s484_s10 = sshll.u32 %s227_s27, 3  ;;  %v235_v32 = vld [vmem:[%s1026_s7 + $0x8] sm:$0xff]  ;;  %v234_v33 = vld [vmem:[%s1026_s7] sm:$0xff] }
  0x94   : > { %276 = vmatprep.subr.mxu0 %v255_v12  ;;  %s230_s18 = scalar_lea.vmem [#allocation5], %s484_s10  ;;  %v232_v35 = vld [vmem:[%s1035_s14] sm:$0xff]  ;;  %v233_v37 = vld [vmem:[%s1035_s14 + $0x8] sm:$0xff] }
  0x95   : > { %277 = vmatpush1.msra.mxu0 %v254_v13  ;;  %v231_v34 = vld [vmem:[%s230_s18] sm:$0xff] }
  0x96   : > { %278 = vmatprep.subr.mxu0 %v253_v14 }
  0x97   : > { %279 = vmatpush1.msra.mxu0 %v252_v15 }
  0x98   : > { %280 = vmatprep.subr.mxu0 %v251_v16 }
  0x99   : > { %281 = vmatpush1.msra.mxu0 %v250_v17 }
  0x9a   : > { %282 = vmatprep.subr.mxu0 %v249_v18 }
  0x9b   : > { %283 = vmatpush1.msra.mxu0 %v248_v19 }
  0x9c   : > { %284 = vmatprep.subr.mxu0 %v247_v20 }
  0x9d   : > { %285 = vmatpush1.msra.mxu0 %v246_v21 }
  0x9e   : > { %286 = vmatprep.subr.mxu0 %v245_v22 }
  0x9f   : > { %287 = vmatpush1.msra.mxu0 %v244_v23 }
  0xa0   : > { %288 = vmatprep.subr.mxu0 %v243_v24 }
  0xa1   : > { %289 = vmatpush1.msra.mxu0 %v242_v25 }
  0xa2   : > { %290 = vmatprep.subr.mxu0 %v241_v26 }
  0xa3   : > { %291 = vmatpush1.msra.mxu0 %v240_v27 }
  0xa4   : > { %292 = vmatprep.subr.mxu0 %v239_v28 }
  0xa5   : > { %293 = vmatpush1.msra.mxu0 %v238_v29 }
  0xa6   : > { %294 = vmatprep.subr.mxu0 %v237_v30 }
  0xa7   : > { %295 = vmatpush1.msra.mxu0 %v236_v31 }
  0xa8   : > { %296 = vmatprep.subr.mxu0 %v235_v32 }
  0xa9   : > { %297 = vmatpush1.msra.mxu0 %v234_v33 }
  0xaa   : > { %331 = vmatmul.mubr.f32.vlgmr.msra.gmra.mxu0 %v231_v34 }
 0x16a   : > { %v332_v36 = vpop.f32.mrf.mxu0 }
 0x16b   : > { %v337_v38 = vadd.f32 %v332_v36, %v232_v35 }
 0x16c   : > { %v334_v39 = vpop.f32.mrf.mxu0 }
 0x16d   : > { %339 = vst [vmem:[%s1035_s14] sm:$0xff] %v337_v38  ;;  %v338_v40 = vadd.f32 %v334_v39, %v233_v37 }
 0x16f   : > { %340 = vst [vmem:[%s1035_s14 + $0x8] sm:$0xff] %v338_v40 }
 0x170 PF: > { %p485_p9 = scmp.ne.s32.totalorder %s795_s1, 3 }
 0x172   : > { %344 = sbr.rel (%p485_p9) target bundleno = 379 (0x17b), region = 48 }
 0x177   : > { %v345_v41 = vld [vmem:[%s1035_s14] sm:$0xff]  ;;  %v346_v42 = vld [vmem:[%s1035_s14 + $0x8] sm:$0xff] }
 0x178   : > { %v347_v43 = vand.u32 2147483647, %v345_v41  ;;  %v348_v44 = vand.u32 2147483647, %v346_v42 }
 0x17a   : > { %349 = vst [vmem:[%s1035_s14] sm:$0xff] %v347_v43  ;;  %350 = vst [vmem:[%s1035_s14 + $0x8] sm:$0xff] %v348_v44 }
 0x17b PF: > { %s1187_s19 = sld [smem:[#allocation19_spill]]  ;;  %s366_s16 = sshll.u32 %s1035_s14, 4  ;;  %s367_s16 = int_to_ptr.vmem [resolvable:$true] %s366_s16 }
 0x17c   : > { %s1188_s21 = sld [smem:[#allocation22_spill]]  ;;  %s352_s0 = scalar_lea.sflag [#allocation7], %s205_s29 }
 0x17d   : > { %s1189_s1 = sld [smem:[#allocation28_spill]]  ;;  %s685_s20 = scalar_lea.vmem %s367_s16, 256 }
 0x17e   : > { %p686_p11 = scmp.ne.s32.totalorder %s367_s16, %s685_s20  ;;  %s821_s7 = smov [#allocation10]  }
 0x17f   : > { %s689_s11 = sshll.u32 %s821_s7, 4  ;;  %s690_s11 = int_to_ptr.vmem [resolvable:$false] %s689_s11 }
 0x180   : > { %s691_s6 = scalar_lea.vmem %s690_s11, 512  ;;  %p692_p10 = scmp.lt.s32.totalorder %s367_s16, %s690_s11 }
 0x181   : > { %s491_s23 = sshll.u32 %s1187_s19, 8  ;;  %p693_p12 = scmp.lt.s32.totalorder %s691_s6, %s685_s20 }
 0x182   : > { %p1191_p13 = scmp.ne.s32.totalorder %s1188_s21, 0 }
 0x183   : > { %s1190_s12 = smov %s1189_s1  ;;  %s364_s13 = scalar_lea.hbm %s1189_s1, %s491_s23 }
 0x184   : > { %p687_p1 = pnand %p686_p11, %p1191_p13  ;;  %p694_p4 = por %p693_p12, %p692_p10 }
 0x186   : > { %p688_p6 = pneg %p687_p1 }
 0x188   : > { %p695_p2 = pnand %p694_p4, %p688_p6 }
 0x18a   : > { %698 = shalt.err (!%p695_p2)
}
 0x18b   : > { %s699_s15 = scalar_lea.hbm %s364_s13, 256  ;;  %s703_s8 = scalar_lea.hbm %s1190_s12, 4096 }
 0x18c   : > { %p700_p0 = scmp.ne.s32.totalorder %s364_s13, %s699_s15  ;;  %p704_p7 = scmp.lt.s32.totalorder %s364_s13, %s1190_s12 }
 0x18d   : > { %p705_p8 = scmp.lt.s32.totalorder %s703_s8, %s699_s15 }
 0x18e   : > { %p701_p5 = pnand %p700_p0, %p1191_p13 }
 0x18f   : > { %p706_p9 = por %p705_p8, %p704_p7 }
 0x190   : > { %p702_p3 = pneg %p701_p5 }
 0x192   : > { %p707_p11 = pnand %p706_p9, %p702_p3 }
 0x194   : > { %710 = shalt.err (!%p707_p11)
}
 0x195   : > { %500 = dma.vmem_to_hbm [thread:$0]  (%p1191_p13), %s367_s16, 256, %s364_s13, %s352_s0  }
 0x196 PF: > { %s1192_s9 = sld [smem:[#allocation21_spill]] }
 0x197   : > { %s1193_s4 = sld [smem:[#allocation17_spill]] }
 0x198   : > { %s1194_s27 = sld [smem:[#allocation23_spill]] }
 0x19c   : > { %p519_p1 = scmp.ge.s32.totalorder %s1192_s9, 2 }
 0x19d   : > { %s378_s10 = sand.u32 1, %s1193_s4  }
 0x19e   : > { %p1195_p6 = scmp.ne.s32.totalorder %s1194_s27, 0  ;;  %s379_s18 = scalar_lea.sflag [#allocation7], %s378_s10 }
 0x1a0   : > { %p513_p10 = pnand %p519_p1, %p1195_p6 }
 0x1a2   : > { %p514_p12 = pneg %p513_p10 }
 0x1a4   : > { %766 = dma.done.wait (%p514_p12), %s379_s18, 256  }
 0x1a5   : > { %768 = vsyncadd (%p514_p12), %s379_s18, 4294967040  ;;  %s27_s29 = sadd.s32 1, %s1192_s9   ;;  %s1196_s19 = sld [smem:[#allocation18_spill]] }
 0x1a6   : > { %p24_p4 = scmp.ge.s32.totalorder %s27_s29, 66   ;;  %s1197_s23 = sld [smem:[#allocation26_spill]] }
 0x1a7   : > { %s1198_s1 = sld [smem:[#allocation20_spill]]  ;;  %s1201_s21 = smov %s775_s22 }
 0x1a8   : > { %s1199_s27 = sld [smem:[#allocation24_spill]]  ;;  %s1203_s0 = smov %s787_s24 }
 0x1a9   : > { %s1200_s30 = sld [smem:[#allocation25_spill]]  ;;  %s1204_s24 = smov %s791_s25 }
 0x1aa   : > { %s1205_s25 = smov %s989_s26  ;;  %s1206_s26 = smov %s807_s28 }
 0x1ab   : > { %s1202_s22 = smov %s1196_s19  ;;  %26 = sbr.rel (!%p24_p4) target bundleno = 18 (0x12), region = 91 }
 0x1af   : > { %s1207_s28 = smov %s1200_s30 }
 0x1b0   :  { %384 = vsyncpa [#allocation6], 1 }
 0x1b1   :  { %386 = vsyncpa [#allocation6 + $0x1], 1 }
 0x1b2   :  { %387 = vsyncpa [#allocation9], 1 }
 0x1b3   :  { %389 = vsyncpa [#allocation9 + $0x1], 1 }
 0x1b4   :  { %390 = vsyncpa [#allocation7], 1 }
 0x1b5   :  { %392 = vsyncpa [#allocation7 + $0x1], 1 }

</bundles_post_ra>
